<compile_context>
chip_gen: v7x
topology: tpu7x:2x2x1
jax: 0.10.0
libtpu: 0.0.40
codegen_flags: <defaults>
</compile_context>

<pallas_src>
import functools
import math

import jax
import jax.numpy as jnp
from jax import lax
from jax.experimental import pallas as pl
from jax.experimental.pallas import tpu as pltpu


def _sdpa_kernel(q_ref, k_ref, v_ref, *rest, inv_scale, has_mask):
    if has_mask:
        m_ref, x_ref, ctx_ref = rest
    else:
        x_ref, ctx_ref = rest
        m_ref = None

    # Pre-scale Q: Sq*D multiplies instead of Sq*Sk on the score matrix.
    q = q_ref[0] * inv_scale          # [Hb, TQ, D], stays in input dtype
    k = k_ref[0]                      # [Hb, Sk, D]
    v = v_ref[0]                      # [Hb, Sk, D]

    # scores: einsum 'hqd,hkd->hqk' — contract on D, no explicit transpose.
    s = lax.dot_general(
        q, k,
        dimension_numbers=(((2,), (2,)), ((0,), (0,))),
        preferred_element_type=jnp.float32,
    )                                 # [Hb, TQ, Sk] f32

    if m_ref is not None:
        m = m_ref[0]                  # [1 or Hb, TQ, Sk] int8 (nonzero = keep)
        s = jnp.where(m != 0, s, jnp.float32(-1000000000.0))

    # Softmax over the key axis (dim=3 of the original 4-D layout).
    s_max = jnp.max(s, axis=-1, keepdims=True)
    p = jnp.exp(s - s_max)
    denom = jnp.sum(p, axis=-1, keepdims=True)
    ctx = p * pl.reciprocal(denom, approx=True)     # [Hb, TQ, Sk] f32

    out = lax.dot_general(
        ctx.astype(v.dtype), v,
        dimension_numbers=(((2,), (1,)), ((0,), (0,))),
        preferred_element_type=jnp.float32,
    )                                 # [Hb, TQ, D]

    x_ref[0] = out.astype(x_ref.dtype)
    ctx_ref[0] = ctx.astype(ctx_ref.dtype)


def _largest_divisor_at_most(n, preferred):
    for p in preferred:
        if p <= n and n % p == 0:
            return p
    return n


def scaled_dot_product_attention(query, key, value, mask=None, *,
                                 q_block_size=None, head_block_size=None):
    """Pallas implementation of ScaledDotProductAttention.forward.

    query: [B, H, Sq, D]; key/value: [B, H, Sk, D]; mask: optional boolean,
    broadcastable to [B, H, Sq, Sk]. Returns (x, context).
    """
    B, H, Sq, D = query.shape
    Sk = key.shape[2]
    inv_scale = 1.0 / math.sqrt(float(D))

    # ---- query-sequence tiling (256 preferred, 128 fallback, else full) ----
    tq = q_block_size if q_block_size is not None else _largest_divisor_at_most(Sq, (256, 128))
    assert Sq % tq == 0, "q_block_size must divide Sq"

    # ---- mask preprocessing: keep broadcast B/H axes, stream as int8 -------
    has_mask = mask is not None
    if has_mask:
        m = jnp.asarray(mask)
        while m.ndim < 4:
            m = m[None]
        Bm, Hm = m.shape[0], m.shape[1]
        # Only the sequence axes are expanded; broadcast B/H axes stay size 1
        # and are re-read via the index_map (no B*H replication in HBM).
        m = jnp.broadcast_to(m, (Bm, Hm, Sq, Sk)).astype(jnp.int8)
        mask_batch_full = (Bm == B)
        mask_head_full = (Hm == H)
    else:
        m = None
        mask_batch_full = False
        mask_head_full = False

    # ---- head blocking under a VMEM budget ---------------------------------
    itemsize = jnp.dtype(query.dtype).itemsize
    ctx_itemsize = itemsize  # context emitted in the input dtype

    def _per_step_bytes(hb):
        q_b = hb * tq * D * itemsize
        kv_b = 2 * hb * Sk * D * itemsize
        x_b = hb * tq * D * itemsize
        ctx_b = hb * tq * Sk * ctx_itemsize
        m_b = (tq * Sk * (hb if mask_head_full else 1)) if has_mask else 0
        return 2 * (q_b + kv_b + x_b + ctx_b + m_b)   # double-buffered

    if head_block_size is None:
        budget = 32 * 1024 * 1024
        hb = 1
        for cand in range(H, 0, -1):
            if H % cand == 0 and _per_step_bytes(cand) <= budget:
                hb = cand
                break
    else:
        hb = head_block_size
    assert H % hb == 0, "head_block_size must divide H"

    grid = (B, H // hb, Sq // tq)

    q_spec = pl.BlockSpec((1, hb, tq, D), lambda b, h, qi: (b, h, qi, 0))
    k_spec = pl.BlockSpec((1, hb, Sk, D), lambda b, h, qi: (b, h, 0, 0))
    v_spec = pl.BlockSpec((1, hb, Sk, D), lambda b, h, qi: (b, h, 0, 0))
    x_spec = pl.BlockSpec((1, hb, tq, D), lambda b, h, qi: (b, h, qi, 0))
    c_spec = pl.BlockSpec((1, hb, tq, Sk), lambda b, h, qi: (b, h, qi, 0))

    in_specs = [q_spec, k_spec, v_spec]
    args = (query, key, value)
    if has_mask:
        m_hb = hb if mask_head_full else 1

        def m_index(b, h, qi, _bf=mask_batch_full, _hf=mask_head_full):
            return (b if _bf else 0, h if _hf else 0, qi, 0)

        in_specs.append(pl.BlockSpec((1, m_hb, tq, Sk), m_index))
        args = args + (m,)

    kernel = functools.partial(_sdpa_kernel, inv_scale=inv_scale, has_mask=has_mask)

    x, context = pl.pallas_call(
        kernel,
        out_shape=(
            jax.ShapeDtypeStruct((B, H, Sq, D), query.dtype),
            jax.ShapeDtypeStruct((B, H, Sq, Sk), query.dtype),
        ),
        grid_spec=pltpu.PrefetchScalarGridSpec(
            num_scalar_prefetch=0,
            grid=grid,
            in_specs=in_specs,
            out_specs=[x_spec, c_spec],
        ),
        compiler_params=pltpu.CompilerParams(
            dimension_semantics=("parallel", "parallel", "parallel"),
            vmem_limit_bytes=48 * 1024 * 1024,
        ),
    )(*args)
    return x, context


def _reference(query, key, value, mask=None):
    d = query.shape[-1]
    s = jnp.einsum("bhqd,bhkd->bhqk",
                   query.astype(jnp.float32),
                   key.astype(jnp.float32)) / jnp.sqrt(jnp.float32(d))
    if mask is not None:
        s = jnp.where(mask, s, -1000000000.0)
    ctx = jax.nn.softmax(s, axis=3)
    x = jnp.einsum("bhqk,bhkd->bhqd", ctx, value.astype(jnp.float32))
    return x, ctx


if __name__ == "__main__":
    ATOL, RTOL = 1e-3, 5e-3

    # --- test 1: small shapes, broadcast [1,1,Sq,Sk] causal mask -------------
    B, H, Sq, Sk, D = 2, 4, 8, 8, 32
    kq, kk, kv = jax.random.split(jax.random.PRNGKey(0), 3)
    query = jax.random.normal(kq, (B, H, Sq, D), dtype=jnp.float32)
    key_t = jax.random.normal(kk, (B, H, Sk, D), dtype=jnp.float32)
    value = jax.random.normal(kv, (B, H, Sk, D), dtype=jnp.float32)
    mask = jnp.tril(jnp.ones((Sq, Sk), dtype=bool))[None, None]   # [1,1,Sq,Sk]

    x, ctx = scaled_dot_product_attention(query, key_t, value, mask)
    jax.block_until_ready((x, ctx))
    x_r, ctx_r = _reference(query, key_t, value,
                            jnp.broadcast_to(mask, (B, H, Sq, Sk)))
    assert jnp.allclose(x, x_r, atol=ATOL, rtol=RTOL)
    assert jnp.allclose(ctx, ctx_r, atol=ATOL, rtol=RTOL)

    # --- test 2: mask=None path (dedicated no-mask kernel variant) ----------
    x2, ctx2 = scaled_dot_product_attention(query, key_t, value, None)
    jax.block_until_ready((x2, ctx2))
    x2_r, ctx2_r = _reference(query, key_t, value, None)
    assert jnp.allclose(x2, x2_r, atol=ATOL, rtol=RTOL)
    assert jnp.allclose(ctx2, ctx2_r, atol=ATOL, rtol=RTOL)

    # --- test 3: exercise the q-tiled path (TQ < Sq) + head fusion ----------
    B3, H3, Sq3, Sk3, D3 = 1, 2, 256, 128, 64
    k1, k2, k3 = jax.random.split(jax.random.PRNGKey(1), 3)
    q3 = jax.random.normal(k1, (B3, H3, Sq3, D3), dtype=jnp.float32)
    kk3 = jax.random.normal(k2, (B3, H3, Sk3, D3), dtype=jnp.float32)
    vv3 = jax.random.normal(k3, (B3, H3, Sk3, D3), dtype=jnp.float32)
    mask3 = jnp.tril(jnp.ones((Sq3, Sk3), dtype=bool))[None, None]
    x3, ctx3 = scaled_dot_product_attention(q3, kk3, vv3, mask3, q_block_size=128)
    jax.block_until_ready((x3, ctx3))
    x3_r, ctx3_r = _reference(q3, kk3, vv3,
                              jnp.broadcast_to(mask3, (B3, H3, Sq3, Sk3)))
    assert jnp.allclose(x3, x3_r, atol=ATOL, rtol=RTOL)
    assert jnp.allclose(ctx3, ctx3_r, atol=ATOL, rtol=RTOL)

    print("KERNEL_OK")
</pallas_src>

<mosaic_0001>
module attributes {stable_mosaic.version = 11 : i64} {
  func.func @_sdpa_kernel(%arg0: i32, %arg1: i32, %arg2: i32, %arg3: memref<1x4x8x32xf32, #tpu.memory_space<vmem>>, %arg4: memref<1x4x8x32xf32, #tpu.memory_space<vmem>>, %arg5: memref<1x4x8x32xf32, #tpu.memory_space<vmem>>, %arg6: memref<1x1x8x8xi8, #tpu.memory_space<vmem>>, %arg7: memref<1x4x8x32xf32, #tpu.memory_space<vmem>>, %arg8: memref<1x4x8x8xf32, #tpu.memory_space<vmem>>) attributes {dimension_semantics = [#tpu.dimension_semantics<parallel>, #tpu.dimension_semantics<parallel>, #tpu.dimension_semantics<parallel>], iteration_bounds = array<i64: 2, 1, 1>, scalar_prefetch = 0 : i64, scratch_operands = 0 : i64, tpu.core_type = #tpu.core_type<tc>, window_params = [{transform_indices = @transform_0, window_bounds = array<i64: 1, 4, 8, 32>}, {transform_indices = @transform_1, window_bounds = array<i64: 1, 4, 8, 32>}, {transform_indices = @transform_2, window_bounds = array<i64: 1, 4, 8, 32>}, {transform_indices = @transform_3, window_bounds = array<i64: 1, 1, 8, 8>}, {transform_indices = @transform_4, window_bounds = array<i64: 1, 4, 8, 32>}, {transform_indices = @transform_5, window_bounds = array<i64: 1, 4, 8, 8>}]} {
    %c0 = arith.constant 0 : index
    %c0_0 = arith.constant 0 : index
    %c0_1 = arith.constant 0 : index
    %c0_2 = arith.constant 0 : index
    %0 = vector.load %arg3[%c0, %c0_0, %c0_1, %c0_2] : memref<1x4x8x32xf32, #tpu.memory_space<vmem>>, vector<1x4x8x32xf32>
    %1 = vector.shape_cast %0 : vector<1x4x8x32xf32> to vector<4x8x32xf32>
    %cst = arith.constant 0.176776692 : f32
    %2 = vector.broadcast %cst : f32 to vector<4x8x32xf32>
    %3 = arith.mulf %1, %2 : vector<4x8x32xf32>
    %c0_3 = arith.constant 0 : index
    %c0_4 = arith.constant 0 : index
    %c0_5 = arith.constant 0 : index
    %c0_6 = arith.constant 0 : index
    %4 = vector.load %arg4[%c0_3, %c0_4, %c0_5, %c0_6] : memref<1x4x8x32xf32, #tpu.memory_space<vmem>>, vector<1x4x8x32xf32>
    %5 = vector.shape_cast %4 : vector<1x4x8x32xf32> to vector<4x8x32xf32>
    %c0_7 = arith.constant 0 : index
    %c0_8 = arith.constant 0 : index
    %c0_9 = arith.constant 0 : index
    %c0_10 = arith.constant 0 : index
    %6 = vector.load %arg5[%c0_7, %c0_8, %c0_9, %c0_10] : memref<1x4x8x32xf32, #tpu.memory_space<vmem>>, vector<1x4x8x32xf32>
    %7 = vector.shape_cast %6 : vector<1x4x8x32xf32> to vector<4x8x32xf32>
    %cst_11 = arith.constant dense<0.000000e+00> : vector<4x8x8xf32>
    %8 = tpu.matmul %3, %5, %cst_11 {dimension_numbers = #tpu.dot_dimension_numbers<[2], [2], [1], [1], [0, 0, 0, 1, 1, 1], [0], [0]>} : vector<4x8x32xf32>, vector<4x8x32xf32>, vector<4x8x8xf32> -> vector<4x8x8xf32>
    %c0_12 = arith.constant 0 : index
    %c0_13 = arith.constant 0 : index
    %c0_14 = arith.constant 0 : index
    %c0_15 = arith.constant 0 : index
    %9 = vector.load %arg6[%c0_12, %c0_13, %c0_14, %c0_15] : memref<1x1x8x8xi8, #tpu.memory_space<vmem>>, vector<1x1x8x8xi8>
    %10 = vector.shape_cast %9 : vector<1x1x8x8xi8> to vector<1x8x8xi8>
    %c0_i8 = arith.constant 0 : i8
    %11 = vector.broadcast %c0_i8 : i8 to vector<1x8x8xi8>
    %12 = arith.cmpi ne, %10, %11 : vector<1x8x8xi8>
    %cst_16 = arith.constant -1.000000e+09 : f32
    %13 = vector.shape_cast %12 : vector<1x8x8xi1> to vector<1x8x8xi1>
    %14 = vector.broadcast %13 : vector<1x8x8xi1> to vector<4x8x8xi1>
    %15 = vector.broadcast %cst_16 : f32 to vector<4x8x8xf32>
    %16 = arith.select %14, %8, %15 : vector<4x8x8xi1>, vector<4x8x8xf32>
    %cst_17 = arith.constant dense<0xFF800000> : vector<4x8xf32>
    %17 = vector.multi_reduction <maximumf>, %16, %cst_17 [2] : vector<4x8x8xf32> to vector<4x8xf32>
    %18 = vector.shape_cast %17 : vector<4x8xf32> to vector<4x8x1xf32>
    %19 = vector.broadcast %18 : vector<4x8x1xf32> to vector<4x8x8xf32>
    %20 = arith.subf %16, %19 : vector<4x8x8xf32>
    %21 = math.exp %20 : vector<4x8x8xf32>
    %cst_18 = arith.constant dense<0.000000e+00> : vector<4x8xf32>
    %22 = vector.multi_reduction <add>, %21, %cst_18 [2] : vector<4x8x8xf32> to vector<4x8xf32>
    %23 = vector.shape_cast %22 : vector<4x8xf32> to vector<4x8x1xf32>
    %24 = tpu.reciprocal %23 {approx = true} : vector<4x8x1xf32> -> vector<4x8x1xf32>
    %25 = vector.broadcast %24 : vector<4x8x1xf32> to vector<4x8x8xf32>
    %26 = arith.mulf %21, %25 : vector<4x8x8xf32>
    %cst_19 = arith.constant dense<0.000000e+00> : vector<4x8x32xf32>
    %27 = tpu.matmul %26, %7, %cst_19 {dimension_numbers = #tpu.dot_dimension_numbers<[2], [1], [1], [2], [0, 0, 0, 1, 1, 2], [0], [0]>} : vector<4x8x8xf32>, vector<4x8x32xf32>, vector<4x8x32xf32> -> vector<4x8x32xf32>
    %c0_20 = arith.constant 0 : index
    %c0_21 = arith.constant 0 : index
    %c0_22 = arith.constant 0 : index
    %c0_23 = arith.constant 0 : index
    %28 = vector.load %arg7[%c0_20, %c0_21, %c0_22, %c0_23] : memref<1x4x8x32xf32, #tpu.memory_space<vmem>>, vector<1x4x8x32xf32>
    %29 = vector.shape_cast %28 : vector<1x4x8x32xf32> to vector<4x8x32xf32>
    %30 = vector.shape_cast %27 : vector<4x8x32xf32> to vector<1x4x8x32xf32>
    tpu.vector_store %arg7[%c0_20, %c0_21, %c0_22, %c0_23], %30 {strides = array<i32>} : memref<1x4x8x32xf32, #tpu.memory_space<vmem>>, vector<1x4x8x32xf32>,
    %c0_24 = arith.constant 0 : index
    %c0_25 = arith.constant 0 : index
    %c0_26 = arith.constant 0 : index
    %c0_27 = arith.constant 0 : index
    %31 = vector.load %arg8[%c0_24, %c0_25, %c0_26, %c0_27] : memref<1x4x8x8xf32, #tpu.memory_space<vmem>>, vector<1x4x8x8xf32>
    %32 = vector.shape_cast %31 : vector<1x4x8x8xf32> to vector<4x8x8xf32>
    %33 = vector.shape_cast %26 : vector<4x8x8xf32> to vector<1x4x8x8xf32>
    tpu.vector_store %arg8[%c0_24, %c0_25, %c0_26, %c0_27], %33 {strides = array<i32>} : memref<1x4x8x8xf32, #tpu.memory_space<vmem>>, vector<1x4x8x8xf32>,
    return
  }
  func.func @transform_0(%arg0: i32, %arg1: i32, %arg2: i32) -> (i32, i32, i32, i32) {
    %c0_i32 = arith.constant 0 : i32
    %c0_i32_0 = arith.constant 0 : i32
    return %arg0, %arg1, %arg2, %c0_i32 : i32, i32, i32, i32
  }
  func.func @transform_1(%arg0: i32, %arg1: i32, %arg2: i32) -> (i32, i32, i32, i32) {
    %c0_i32 = arith.constant 0 : i32
    %c0_i32_0 = arith.constant 0 : i32
    %c0_i32_1 = arith.constant 0 : i32
    return %arg0, %arg1, %c0_i32, %c0_i32_0 : i32, i32, i32, i32
  }
  func.func @transform_2(%arg0: i32, %arg1: i32, %arg2: i32) -> (i32, i32, i32, i32) {
    %c0_i32 = arith.constant 0 : i32
    %c0_i32_0 = arith.constant 0 : i32
    %c0_i32_1 = arith.constant 0 : i32
    return %arg0, %arg1, %c0_i32, %c0_i32_0 : i32, i32, i32, i32
  }
  func.func @transform_3(%arg0: i32, %arg1: i32, %arg2: i32) -> (i32, i32, i32, i32) {
    %c0_i32 = arith.constant 0 : i32
    %c0_i32_0 = arith.constant 0 : i32
    %c0_i32_1 = arith.constant 0 : i32
    %c0_i32_2 = arith.constant 0 : i32
    return %c0_i32, %c0_i32_0, %arg2, %c0_i32_1 : i32, i32, i32, i32
  }
  func.func @transform_4(%arg0: i32, %arg1: i32, %arg2: i32) -> (i32, i32, i32, i32) {
    %c0_i32 = arith.constant 0 : i32
    %c0_i32_0 = arith.constant 0 : i32
    return %arg0, %arg1, %arg2, %c0_i32 : i32, i32, i32, i32
  }
  func.func @transform_5(%arg0: i32, %arg1: i32, %arg2: i32) -> (i32, i32, i32, i32) {
    %c0_i32 = arith.constant 0 : i32
    %c0_i32_0 = arith.constant 0 : i32
    return %arg0, %arg1, %arg2, %c0_i32 : i32, i32, i32, i32
  }
}

</mosaic_0001>

<bundles_post_ra>
// kernel: tpu_custom_call.1
= control target key start
LH: loop header
LB: loop body
LE: loop exit
PB: predicated region body
PF: predicated region fallthrough
CT: control target
= control target key end

     0   :  { %s2153_s0 = inlined_call_operand.hbm [shape: f32[2,4,8,32], index: 0, kind: input, shape index: {}]   ;;  %s2154_s1 = inlined_call_operand.hbm [shape: f32[2,4,8,32], index: 1, kind: input, shape index: {}]   ;;  %s2155_s2 = inlined_call_operand.hbm [shape: f32[2,4,8,32], index: 2, kind: input, shape index: {}]   ;;  %s2156_s3 = inlined_call_operand.vmem [shape: s8[1,1,8,8], index: 3, kind: input, shape index: {}]   ;;  %s2157_s4 = inlined_call_operand.hbm [shape: f32[2,4,8,32], index: 4, kind: output, shape index: {0}]   ;;  %s2158_s5 = inlined_call_operand.hbm [shape: f32[2,4,8,8], index: 5, kind: output, shape index: {1}]  }
   0x1   :  { %2171 = sst [smem:[#allocation20_spill]] %s2154_s1 }
   0x2   :  { %11 = vsyncpa [#allocation3], 0 }
   0x3   :  { %13 = vsyncpa [#allocation3 + $0x1], 0 }
   0x4   :  { %14 = vsyncpa [#allocation6], 0 }
   0x5   :  { %16 = vsyncpa [#allocation6 + $0x1], 0 }
   0x6   :  { %17 = vsyncpa [#allocation4], 0 }
   0x7   :  { %19 = vsyncpa [#allocation4 + $0x1], 0 }
   0x8   :  { %20 = vsyncpa [#allocation10], 0 }
   0x9   :  { %22 = vsyncpa [#allocation10 + $0x1], 0  ;;  %s1760_s18 = smov 0   ;;  %s1762_s19 = smov 0  }
   0xa   :  { %s1764_s20 = smov 0   ;;  %s1766_s21 = smov 0  }
   0xb   :  { %s1768_s22 = smov 0   ;;  %s1770_s23 = smov 0  }
   0xc LB: > { %2172 = sst [smem:[#allocation15_spill]] %s1712_s22  ;;  %s1791_s24 = sadd.s32 4294967295, %s1716_s23   ;;  %s1716_s23 = sphi %s1770_s23, %s28_s23   ;;  %s1712_s22 = sphi %s1768_s22, %s2201_s22   ;;  %s1708_s21 = sphi %s1766_s21, %s2200_s21   ;;  %s1704_s20 = sphi %s1764_s20, %s2204_s20   ;;  %s1700_s19 = sphi %s1762_s19, %s2203_s19   ;;  %s1696_s18 = sphi %s1760_s18, %s2202_s18  }
   0xd   : > { %2173 = sst [smem:[#allocation16_spill]] %s1716_s23  ;;  %s1308_s25 = sadd.s32 4294967294, %s1716_s23  }
   0xe   : > { %s47_s26 = sadd.s32 1, %s1712_s22  ;;  %s58_s27 = sadd.s32 1, %s1704_s20 }
   0xf   : > { %p49_p0 = scmp.ge.s32.totalorder %s47_s26, 2  ;;  %p65_p1 = scmp.ne.s32.totalorder %s1704_s20, %s1700_s19 }
  0x10   : > { %p66_p2 = scmp.eq.s32.totalorder %s1716_s23, 0  ;;  %p71_p3 = scmp.ne.s32.totalorder %s1700_s19, %s1696_s18 }
  0x11   : > { %s2206_s26 = smov (%p49_p0, %s47_s26), 0  ;;  %p72_p5 = scmp.eq.s32.totalorder %s1791_s24, 0 }
  0x12   : > { %2174 = sst [smem:[#allocation17_spill]] %s2206_s26  ;;  %p1803_p4 = por %p66_p2, %p65_p1 }
  0x13   : > { %s51_s29 = ssub.s32 %s1712_s22, %s2206_s26  ;;  %p181_p6 = scmp.eq.s32.totalorder %s1791_s24, 1 }
  0x14   : > { %p56_p7 = scmp.eq.s32.totalorder %s51_s29, 0  ;;  %p1811_p8 = por %p72_p5, %p71_p3 }
  0x15   : > { %p1815_p9 = por %p181_p6, %p65_p1  ;;  %p187_p10 = scmp.eq.s32.totalorder %s1308_s25, 1 }
  0x16   : > { %s2176_s30 = scalar_select %p1811_p8, 1, 0 }
  0x17   : > { %s2177_s6 = scalar_select %p1815_p9, 1, 0 }
  0x18   : > { %s1820_s7 = scalar_select %p56_p7, %s1704_s20, %s58_s27  }
  0x19   : > { %p1822_p11 = por %p187_p10, %p71_p3  ;;  %p1435_p13 = scmp.lt.s32.totalorder %s1716_s23, 2 }
  0x1a   : > { %2178 = sst [smem:[#allocation18_spill]] %s1820_s7  ;;  %s2159_s9 = sand.u32 1, %s1704_s20  }
  0x1b   : > { %s2179_s8 = scalar_select %p1822_p11, 1, 0 }
  0x1c   : > { %s1831_s10 = sshll.u32 %s2159_s9, 5  ;;  %s1834_s11 = sshll.u32 %s1712_s22, 9 }
  0x1d   : > { %2180 = sst [smem:[#allocation19_spill]] %s2179_s8  ;;  %p1838_p0 = pnand %p1435_p13, %p1803_p4 }
  0x1e   : > { %s268_s13 = sand.u32 1, %s1716_s23   ;;  %s2182_s1 = sld [smem:[#allocation20_spill]] }
  0x1f   : > { %s272_s17 = scalar_lea.vmem [#allocation5], %s1831_s10  ;;  %s1854_s27 = scalar_lea.sflag [#allocation6], %s268_s13 }
  0x20   : > { %s281_s25 = sshll.u32 %s272_s17, 4  ;;  %p1860_p4 = pneg %p1838_p0  ;;  %s1851_s25 = int_to_ptr.vmem [resolvable:$true] %s281_s25 }
  0x24   : > { %s1847_s16 = scalar_lea.hbm %s2182_s1, %s1834_s11  ;;  %s1513_s17 = scalar_lea.hbm %s2182_s1, 1024 }
  0x25   : > { %s1508_s28 = scalar_lea.hbm %s1847_s16, 512  ;;  %p1514_p7 = scmp.lt.u32.totalorder %s1847_s16, %s2182_s1 }
  0x26   : > { %p1509_p3 = scmp.ne.s32.totalorder %s1847_s16, %s1508_s28  ;;  %p1515_p10 = scmp.lt.u32.totalorder %s1513_s17, %s1508_s28 }
  0x27   : > { %p1517_p12 = scmp.lt.u32.totalorder %s1508_s28, %s1847_s16 }
  0x28   : > { %p1511_p5 = pnand %p1860_p4, %p1509_p3  ;;  %p1516_p13 = por %p1515_p10, %p1514_p7 }
  0x2a   : > { %p1512_p6 = pneg %p1511_p5  ;;  %p1518_p1 = por %p1517_p12, %p1516_p13 }
  0x2c   : > { %p1519_p2 = pnand %p1518_p1, %p1512_p6 }
  0x2e   : > { %1522 = shalt.err (!%p1519_p2)
}
  0x2f   : > { %s1523_s13 = scalar_lea.vmem %s1851_s25, 512  ;;  %s1718_s14 = smov [#allocation5]  }
  0x30   : > { %p1524_p3 = scmp.ne.s32.totalorder %s1851_s25, %s1523_s13  ;;  %s1528_s15 = sshll.u32 %s1718_s14, 4  ;;  %s1529_s15 = int_to_ptr.vmem [resolvable:$false] %s1528_s15 }
  0x31   : > { %s1530_s26 = scalar_lea.vmem %s1529_s15, 1024  ;;  %p1531_p9 = scmp.lt.s32.totalorder %s1851_s25, %s1529_s15 }
  0x32   : > { %p1526_p5 = pnand %p1524_p3, %p1860_p4  ;;  %p1532_p8 = scmp.lt.s32.totalorder %s1530_s26, %s1523_s13 }
  0x34   : > { %p1527_p11 = pneg %p1526_p5  ;;  %p1533_p7 = por %p1532_p8, %p1531_p9 }
  0x36   : > { %p1534_p10 = pnand %p1533_p7, %p1527_p11 }
  0x38   : > { %1537 = shalt.err (!%p1534_p10)
}
  0x39   : > { %s2163_s9 = smov 128   ;;  %s2165_s28 = smov 8  }
  0x3a   : > { %1424 = dma.hbm_to_vmem [thread:$0]  (!%p1838_p0), %s1847_s16, 512, %s1851_s25, %s1854_s27, %s2163_s9, %s2163_s9, %s2165_s28  }
  0x3b   : > { %p2184_p8 = scmp.lt.s32.totalorder %s1716_s23, 3  ;;  %p2185_p9 = scmp.ge.s32.totalorder %s1716_s23, 1 }
  0x3c   : > { %s1899_s15 = scalar_lea.hbm %s2153_s0, %s1834_s11  ;;  %s248_s26 = scalar_lea.vmem [#allocation2], %s1831_s10 }
  0x3d   : > { %p1891_p11 = pnand %p2185_p9, %p2184_p8  ;;  %s258_s1 = sshll.u32 %s248_s26, 4  ;;  %s1902_s1 = int_to_ptr.vmem [resolvable:$true] %s258_s1 }
  0x3e   : > { %s1908_s9 = scalar_lea.hbm %s2155_s2, %s1834_s11  ;;  %s2187_s28 = sand.u32 1, %s1704_s20  }
  0x3f   : > { %s2186_s17 = scalar_select %p1891_p11, 1, 0 }
  0x40   : > { %s1912_s22 = scalar_lea.sflag [#allocation3], %s2187_s28  ;;  %s1538_s7 = scalar_lea.hbm %s1899_s15, 512 }
  0x41   : > { %p1539_p12 = scmp.ne.s32.totalorder %s1899_s15, %s1538_s7  ;;  %s1543_s23 = scalar_lea.hbm %s2153_s0, 1024 }
  0x42   : > { %p1544_p6 = scmp.lt.u32.totalorder %s1899_s15, %s2153_s0  ;;  %p1545_p13 = scmp.lt.u32.totalorder %s1543_s23, %s1538_s7 }
  0x43   : > { %p1541_p1 = pnand %p1539_p12, %p1860_p4  ;;  %p1547_p5 = scmp.lt.u32.totalorder %s1538_s7, %s1899_s15 }
  0x44   : > { %p1546_p3 = por %p1545_p13, %p1544_p6 }
  0x45   : > { %p1542_p2 = pneg %p1541_p1 }
  0x46   : > { %p1548_p7 = por %p1547_p5, %p1546_p3 }
  0x48   : > { %p1549_p10 = pnand %p1548_p7, %p1542_p2 }
  0x4a   : > { %1552 = shalt.err (!%p1549_p10)
}
  0x4b   : > { %s1553_s11 = scalar_lea.vmem %s1902_s1, 512  ;;  %s1721_s28 = smov [#allocation2]  }
  0x4c   : > { %p1554_p8 = scmp.ne.s32.totalorder %s1902_s1, %s1553_s11  ;;  %s1558_s16 = sshll.u32 %s1721_s28, 4  ;;  %s1559_s16 = int_to_ptr.vmem [resolvable:$false] %s1558_s16 }
  0x4d   : > { %s1560_s8 = scalar_lea.vmem %s1559_s16, 1024  ;;  %p1561_p1 = scmp.lt.s32.totalorder %s1902_s1, %s1559_s16 }
  0x4e   : > { %p1556_p9 = pnand %p1554_p8, %p1860_p4  ;;  %p1562_p11 = scmp.lt.s32.totalorder %s1560_s8, %s1553_s11 }
  0x50   : > { %p1557_p12 = pneg %p1556_p9  ;;  %p1563_p6 = por %p1562_p11, %p1561_p1 }
  0x52   : > { %p1564_p13 = pnand %p1563_p6, %p1557_p12 }
  0x54   : > { %1567 = shalt.err (!%p1564_p13)
}
  0x55   : > { %s2188_s23 = smov 8   ;;  %s2189_s7 = smov 128  }
  0x56   : > { %1421 = dma.hbm_to_vmem [thread:$0]  (!%p1838_p0), %s1899_s15, 512, %s1902_s1, %s1912_s22, %s2189_s7, %s2189_s7, %s2188_s23  }
  0x57   : > { %s295_s25 = scalar_lea.vmem [#allocation7], %s1831_s10  ;;  %s1568_s14 = scalar_lea.hbm %s1908_s9, 512 }
  0x58   : > { %s304_s13 = sshll.u32 %s295_s25, 4  ;;  %p1569_p11 = scmp.ne.s32.totalorder %s1908_s9, %s1568_s14  ;;  %s1940_s13 = int_to_ptr.vmem [resolvable:$true] %s304_s13 }
  0x59   : > { %s1573_s28 = scalar_lea.hbm %s2155_s2, 1024  ;;  %p1574_p5 = scmp.lt.u32.totalorder %s1908_s9, %s2155_s2 }
  0x5a   : > { %p1571_p2 = pnand %p1569_p11, %p1860_p4  ;;  %p1575_p7 = scmp.lt.u32.totalorder %s1573_s28, %s1568_s14 }
  0x5b   : > { %p1577_p8 = scmp.lt.u32.totalorder %s1568_s14, %s1908_s9 }
  0x5c   : > { %p1572_p3 = pneg %p1571_p2  ;;  %p1576_p10 = por %p1575_p7, %p1574_p5 }
  0x5e   : > { %p1578_p9 = por %p1577_p8, %p1576_p10 }
  0x60   : > { %p1579_p12 = pnand %p1578_p9, %p1572_p3 }
  0x62   : > { %1582 = shalt.err (!%p1579_p12)
}
  0x63   : > { %s1583_s1 = scalar_lea.vmem %s1940_s13, 512  ;;  %s1722_s22 = smov [#allocation7]  }
  0x64   : > { %p1584_p1 = scmp.ne.s32.totalorder %s1940_s13, %s1583_s1  ;;  %s1588_s10 = sshll.u32 %s1722_s22, 4  ;;  %s1589_s10 = int_to_ptr.vmem [resolvable:$false] %s1588_s10 }
  0x65   : > { %s1590_s15 = scalar_lea.vmem %s1589_s10, 1024  ;;  %p1591_p11 = scmp.lt.s32.totalorder %s1940_s13, %s1589_s10 }
  0x66   : > { %p1586_p6 = pnand %p1584_p1, %p1860_p4  ;;  %p1592_p2 = scmp.lt.s32.totalorder %s1590_s15, %s1583_s1 }
  0x68   : > { %p1587_p13 = pneg %p1586_p6  ;;  %p1593_p5 = por %p1592_p2, %p1591_p11 }
  0x6a   : > { %p1594_p7 = pnand %p1593_p5, %p1587_p13 }
  0x6c   : > { %1597 = shalt.err (!%p1594_p7)
}
  0x6d   : > { %1427 = dma.hbm_to_vmem [thread:$0]  (!%p1838_p0), %s1908_s9, 512, %s1940_s13, %s1854_s27, %s2189_s7, %s2189_s7, %s2188_s23  }
  0x6e   : > { %p2190_p4 = scmp.ne.s32.totalorder %s2186_s17, 0 }
  0x6f   : > { %s1970_s29 = sand.u32 (!%p2190_p4), 1, %s1700_s19   ;;  %p2191_p3 = scmp.ne.s32.totalorder (!%p2190_p4), %s2176_s30, 0 }
  0x70   : > { %316 = sbr.rel (%p2190_p4) target bundleno = 890 (0x37a), region = 36  ;;  %s1973_s25 = sshll.u32 (!%p2190_p4), %s1970_s29, 5 }
  0x71   : > { %s319_s12 = scalar_lea.sflag (!%p2190_p4), [#allocation3], %s1970_s29  ;;  %s322_s14 = scalar_lea.vmem (!%p2190_p4), [#allocation2], %s1973_s25 }
  0x77   : > { %1679 = dma.done.wait (%p2191_p3), %s319_s12, 512  }
  0x78   : > { %1681 = vsyncadd (%p2191_p3), %s319_s12, 4294966784  ;;  %s327_s27 = sand.u32 1, %s1791_s24   ;;  %s331_s17 = scalar_lea.vmem [#allocation5], %s1973_s25 }
  0x79   : > { %s328_s9 = scalar_lea.sflag [#allocation6], %s327_s27 }
  0x7a   : > { %1683 = dma.done.wait (%p2191_p3), %s328_s9, 1024  }
  0x7b   : > { %1685 = vsyncadd (%p2191_p3), %s328_s9, 4294966272  ;;  %v1723_v0 = vmov 0.0   ;;  %vm1724_vm0 = vmmov 0   ;;  %vm413_vm1 = vcmask 261120   ;;  %v405_v1 = vld [vmem:[%s331_s17] sm:$0xff]  ;;  %v406_v3 = vld [vmem:[%s331_s17 + $0x8] sm:$0xff] }
  0x7c   : > { %1368 = vmatprep.subr.mxu0 %v1723_v0  ;;  %1370 = vmatprep.mubr.msk.f32.mxu0 %vm1724_vm0, %v1723_v0  ;;  %v397_v2 = vld [vmem:[%s322_s14] sm:$0xff]  ;;  %v398_v5 = vld [vmem:[%s322_s14 + $0x8] sm:$0xff]  ;;  %v399_v6 = vld [vmem:[%s322_s14 + $0x10] sm:$0xff]  ;;  %v1725_v14 = vmov 0   ;;  %vm729_vm4 = vcmask 64512   ;;  %s340_s23 = scalar_lea.vmem [#allocation7], %s1973_s25 }
  0x7d   : > { %1373 = vmatprep.subr.mxu1 %v1723_v0  ;;  %1375 = vmatprep.mubr.msk.f32.mxu1 %vm1724_vm0, %v1723_v0  ;;  %v401_v4 = vmul.f32 0.17677669, %v397_v2  ;;  %v407_v7 = vld [vmem:[%s331_s17 + $0x10] sm:$0xff]  ;;  %v402_v8 = vmul.f32 0.17677669, %v398_v5  ;;  %v400_v9 = vld [vmem:[%s322_s14 + $0x18] sm:$0xff] }
  0x7e   : > { %1369 = vmatpush3.xpose.msk.msra.mxu0 %vm413_vm1, %v405_v1  ;;  %1374 = vmatpush3.xpose.msk.msra.mxu1 %vm413_vm1, %v406_v3  ;;  %v408_v10 = vld [vmem:[%s331_s17 + $0x18] sm:$0xff]  ;;  %v403_v11 = vmul.f32 0.17677669, %v399_v6  ;;  %v404_v12 = vmul.f32 0.17677669, %v400_v9  ;;  %v409_v54 = vld [vmem:[%s340_s23] sm:$0xff] }
  0x7f   : > { %1378 = vmatprep.subr.mxu0 %v1723_v0  ;;  %1383 = vmatprep.subr.mxu1 %v1723_v0  ;;  %v718_v13 = vld [vmem:[%s2156_s3] sm:$0x3]  ;;  %v410_v55 = vld [vmem:[%s340_s23 + $0x8] sm:$0xff]  ;;  %v411_v62 = vld [vmem:[%s340_s23 + $0x10] sm:$0xff]  ;;  %s385_s7 = scalar_lea.vmem [#allocation9], %s1973_s25  ;;  %s1350_s13 = sshll.u32 %s1708_s21, 9 }
  0x80   : > { %vm719_vm2 = vnez %v718_v13  ;;  %v412_v3 = vld [vmem:[%s340_s23 + $0x18] sm:$0xff]  ;;  %s2058_s28 = scalar_lea.hbm %s2158_s5, %s1350_s13  ;;  %s1115_s16 = sshll.u32 %s385_s7, 4  ;;  %s2060_s16 = int_to_ptr.vmem [resolvable:$true] %s1115_s16 }
  0x81   : > { %1371 = vmatmul.mubr.msk.f32.vlgmr.msra.gmra.mrb[0].mxu0 %vm413_vm1, %v401_v4  ;;  %1376 = vmatmul.mubr.msk.f32.vlgmr.msra.gmra.mrb[0].mxu1 %vm413_vm1, %v402_v8  ;;  %v720_v15 = vsel %vm719_vm2, 16843009, %v1725_v14  ;;  %s1080_s8 = scalar_lea.sflag [#allocation10], %s1970_s29  ;;  %s1598_s1 = scalar_lea.vmem %s2060_s16, 512 }
  0x82   : > { %1379 = vmatpush3.xpose.msk.msra.mxu0 %vm413_vm1, %v407_v7  ;;  %1380 = vmatprep.mubr.msk.f32.mxu0 %vm1724_vm0, %v1723_v0  ;;  %v721_v16 = vunpack.c.0.s8 %v720_v15  ;;  %p1599_p0 = scmp.ne.s32.totalorder %s2060_s16, %s1598_s1  ;;  %p2194_p10 = scmp.ne.s32.totalorder %s2177_s6, 0 }
  0x83   : > { %1384 = vmatpush3.xpose.msk.msra.mxu1 %vm413_vm1, %v408_v10  ;;  %1385 = vmatprep.mubr.msk.f32.mxu1 %vm1724_vm0, %v1723_v0  ;;  %s1726_s22 = smov [#allocation9]  }
  0x84   : > { %1388 = vmatprep.subr.mxu0 %v1723_v0  ;;  %1393 = vmatprep.subr.mxu1 %v1723_v0  ;;  %vm2016_vm3 = vcmp.ne.s32.totalorder %v721_v16, 0  ;;  %p1600_p8 = pnand %p1599_p0, %p2194_p10  ;;  %s1602_s10 = sshll.u32 %s1726_s22, 4  ;;  %s1603_s10 = int_to_ptr.vmem [resolvable:$false] %s1602_s10 }
  0x85   : > { %1381 = vmatmul.mubr.msk.f32.vlgmr.msra.gmra.mrb[2].mxu0 %vm413_vm1, %v403_v11  ;;  %s1604_s15 = scalar_lea.vmem %s1603_s10, 1024  ;;  %p1605_p12 = scmp.lt.s32.totalorder %s2060_s16, %s1603_s10 }
  0x86   : > { %1386 = vmatmul.mubr.msk.f32.vlgmr.msra.gmra.mrb[2].mxu1 %vm413_vm1, %v404_v12  ;;  %1390 = vmatprep.mubr.msk.f32.mxu0 %vm1724_vm0, %v1723_v0  ;;  %p1601_p9 = pneg %p1600_p8  ;;  %p1606_p1 = scmp.lt.s32.totalorder %s1604_s15, %s1598_s1 }
  0x87   : > { %1395 = vmatprep.mubr.msk.f32.mxu1 %vm1724_vm0, %v1723_v0  ;;  %1389 = vmatpush3.msra.mxu0 %v409_v54 }
  0x88   : > { %1398 = vmatprep.subr.mxu0 %v1723_v0  ;;  %1394 = vmatpush3.msra.mxu1 %v410_v55  ;;  %p1607_p6 = por %p1606_p1, %p1605_p12 }
  0x89   : > { %1403 = vmatprep.subr.mxu1 %v1723_v0 }
  0x8a   : > { %p1608_p13 = pnand %p1607_p6, %p1601_p9 }
 0x154   : > { %v486_v18 = vpop.f32.mrb[0].mxu0  ;;  %v562_v19 = vpop.f32.mrb[0].mxu1 }
 0x155   : > { %v725_v20 = vsel %vm2016_vm3, %v486_v18, -1e+09  ;;  %v1372_v21 = vpop.f32.mrb[1].mxu0  ;;  %v726_v22 = vsel %vm2016_vm3, %v562_v19, -1e+09  ;;  %v1377_v23 = vpop.f32.mrb[1].mxu1 }
 0x156   : > { %v730_v24 = vsel %vm729_vm4, %v725_v20, -inf  ;;  %v733_v26 = vsel %vm729_vm4, %v726_v22, -inf }
 0x157   : > { %731 = vmax.xlane.f32.xlu0 %v730_v24 }
 0x158   : > { %v638_v25 = vpop.f32.mrb[2].mxu0 }
 0x159   : > { %v727_v27 = vsel %vm2016_vm3, %v638_v25, -1e+09  ;;  %v1382_v28 = vpop.f32.mrb[3].mxu0  ;;  %v714_v29 = vpop.f32.mrb[2].mxu1 }
 0x15a   : > { %v736_v30 = vsel %vm729_vm4, %v727_v27, -inf  ;;  %v728_v31 = vsel %vm2016_vm3, %v714_v29, -1e+09  ;;  %v1387_v32 = vpop.f32.mrb[3].mxu1 }
 0x15b   : > { %734 = vmax.xlane.f32.xlu0 %v733_v26  ;;  %737 = vmax.xlane.f32.xlu1 %v736_v30  ;;  %v739_v33 = vsel %vm729_vm4, %v728_v31, -inf }
 0x15f   : > { %740 = vmax.xlane.f32.xlu1 %v739_v33 }
 0x1e4   : > { %v732_v34 = vpop.xlane.xlu0 %731 }
 0x1e5   : > { %v742_v35 = vsub.f32 %v725_v20, %v732_v34 }
 0x1e7   : > { %v746_v36 = vmul.f32 1.442695, %v742_v35 }
 0x1e8   : > { %v735_v37 = vpop.xlane.xlu0 %734  ;;  %v738_v38 = vpop.xlane.xlu1 %737 }
 0x1e9   : > { %1492 = vpow2.f32 %v746_v36  ;;  %v743_v39 = vsub.f32 %v726_v22, %v735_v37  ;;  %v744_v40 = vsub.f32 %v727_v27, %v738_v38 }
 0x1eb   : > { %v748_v41 = vmul.f32 1.442695, %v743_v39  ;;  %v750_v42 = vmul.f32 1.442695, %v744_v40 }
 0x1ec   : > { %v741_v43 = vpop.xlane.xlu1 %740 }
 0x1ed   : > { %1494 = vpow2.f32 %v748_v41  ;;  %v745_v44 = vsub.f32 %v728_v31, %v741_v43 }
 0x1ee   : > { %1496 = vpow2.f32 %v750_v42 }
 0x1ef   : > { %v752_v45 = vmul.f32 1.442695, %v745_v44 }
 0x1f1   : > { %1498 = vpow2.f32 %v752_v45 }
 0x1f3   : > { %v1493_v46 = vpop.eup %1492 }
 0x1f4   : > { %v754_v47 = vsel %vm729_vm4, %v1493_v46, 0.0 }
 0x1f5   : > { %755 = vadd.xlane.f32.xlu0 %v754_v47 }
 0x1f7   : > { %v1495_v48 = vpop.eup %1494 }
 0x1f8   : > { %v1497_v49 = vpop.eup %1496  ;;  %v757_v50 = vsel %vm729_vm4, %v1495_v48, 0.0 }
 0x1f9   : > { %758 = vadd.xlane.f32.xlu1 %v757_v50  ;;  %v760_v51 = vsel %vm729_vm4, %v1497_v49, 0.0 }
 0x1fa   : > { %761 = vadd.xlane.f32.xlu0 %v760_v51 }
 0x1fb   : > { %v1499_v52 = vpop.eup %1498 }
 0x1fc   : > { %v763_v53 = vsel %vm729_vm4, %v1499_v52, 0.0 }
 0x1fd   : > { %764 = vadd.xlane.f32.xlu1 %v763_v53 }
 0x282   : > { %v756_v56 = vpop.xlane.xlu0 %755 }
 0x283   : > { %1500 = vrcp.f32 %v756_v56 }
 0x286   : > { %v759_v57 = vpop.xlane.xlu1 %758 }
 0x287   : > { %v762_v58 = vpop.xlane.xlu0 %761  ;;  %1502 = vrcp.f32 %v759_v57 }
 0x288   : > { %1504 = vrcp.f32 %v762_v58 }
 0x28a   : > { %v765_v59 = vpop.xlane.xlu1 %764 }
 0x28b   : > { %1506 = vrcp.f32 %v765_v59 }
 0x28d   : > { %v1501_v60 = vpop.eup %1500 }
 0x28e   : > { %v770_v61 = vmul.f32 %v1501_v60, %v1493_v46 }
 0x290   : > { %1070 = vst.msk [vmem:[%s385_s7] sm:$0xff] %vm729_vm4, %v770_v61  ;;  %1391 = vmatmul.mubr.msk.f32.vlgmr.msra.gmra.mrb[4].mxu0 %vm729_vm4, %v770_v61 }
 0x291   : > { %v1503_v63 = vpop.eup %1502  ;;  %1399 = vmatpush3.msra.mxu0 %v411_v62  ;;  %1400 = vmatprep.mubr.msk.f32.mxu0 %vm1724_vm0, %v1723_v0 }
 0x292   : > { %v1505_v1 = vpop.eup %1504  ;;  %v771_v2 = vmul.f32 %v1503_v63, %v1495_v48 }
 0x293   : > { %v772_v4 = vmul.f32 %v1505_v1, %v1497_v49 }
 0x294   : > { %1071 = vst.msk [vmem:[%s385_s7 + $0x8] sm:$0xff] %vm729_vm4, %v771_v2  ;;  %1396 = vmatmul.mubr.msk.f32.vlgmr.msra.gmra.mrb[4].mxu1 %vm729_vm4, %v771_v2 }
 0x295   : > { %v1507_v5 = vpop.eup %1506  ;;  %1072 = vst.msk [vmem:[%s385_s7 + $0x10] sm:$0xff] %vm729_vm4, %v772_v4  ;;  %1401 = vmatmul.mubr.msk.f32.vlgmr.msra.gmra.mrb[6].mxu0 %vm729_vm4, %v772_v4  ;;  %1404 = vmatpush3.msra.mxu1 %v412_v3 }
 0x296   : > { %v773_v6 = vmul.f32 %v1507_v5, %v1499_v52  ;;  %1405 = vmatprep.mubr.msk.f32.mxu1 %vm1724_vm0, %v1723_v0 }
 0x298   : > { %1073 = vst.msk [vmem:[%s385_s7 + $0x18] sm:$0xff] %vm729_vm4, %v773_v6  ;;  %1406 = vmatmul.mubr.msk.f32.vlgmr.msra.gmra.mrb[6].mxu1 %vm729_vm4, %v773_v6 }
 0x299   : > { %1611 = shalt.err (!%p1608_p13)
}
 0x29a   : > { %s1612_s12 = scalar_lea.hbm %s2058_s28, 512  ;;  %s1616_s9 = scalar_lea.hbm %s2158_s5, 1024 }
 0x29b   : > { %p1613_p11 = scmp.ne.s32.totalorder %s2058_s28, %s1612_s12  ;;  %p1617_p7 = scmp.lt.u32.totalorder %s2058_s28, %s2158_s5 }
 0x29c   : > { %p1618_p4 = scmp.lt.u32.totalorder %s1616_s9, %s1612_s12  ;;  %p1620_p0 = scmp.lt.u32.totalorder %s1612_s12, %s2058_s28 }
 0x29d   : > { %p1614_p2 = pnand %p1613_p11, %p2194_p10 }
 0x29e   : > { %p1619_p3 = por %p1618_p4, %p1617_p7 }
 0x29f   : > { %p1615_p5 = pneg %p1614_p2 }
 0x2a0   : > { %p1621_p8 = por %p1620_p0, %p1619_p3 }
 0x2a2   : > { %p1622_p9 = pnand %p1621_p8, %p1615_p5 }
 0x2a4   : > { %1625 = shalt.err (!%p1622_p9)
}
 0x2a5   : > { %s1727_s30 = smov 128   ;;  %s1728_s23 = smov 8  }
 0x2a6   : > { %1415 = dma.vmem_to_hbm [thread:$0]  (%p2194_p10), %s2060_s16, 512, %s2058_s28, %s1080_s8, %s1727_s30, %s1727_s30, %s1728_s23  }
 0x2a7   : > { %s378_s7 = scalar_lea.vmem [#allocation8], %s1973_s25  ;;  %s2100_s28 = scalar_lea.hbm %s2157_s4, %s1350_s13 }
 0x2a8   : > { %s1096_s26 = sshll.u32 %s378_s7, 4  ;;  %s1075_s16 = scalar_lea.sflag [#allocation4], %s1970_s29  ;;  %s2092_s26 = int_to_ptr.vmem [resolvable:$true] %s1096_s26 }
 0x2a9   : > { %s1626_s8 = scalar_lea.vmem %s2092_s26, 512  ;;  %s1729_s1 = smov [#allocation8]  }
 0x2aa   : > { %p1627_p12 = scmp.ne.s32.totalorder %s2092_s26, %s1626_s8  ;;  %s1630_s22 = sshll.u32 %s1729_s1, 4  ;;  %s1631_s22 = int_to_ptr.vmem [resolvable:$false] %s1630_s22 }
 0x2ab   : > { %s1632_s10 = scalar_lea.vmem %s1631_s22, 1024  ;;  %p1633_p13 = scmp.lt.s32.totalorder %s2092_s26, %s1631_s22 }
 0x2ac   : > { %p1628_p1 = pnand %p1627_p12, %p2194_p10  ;;  %p1634_p11 = scmp.lt.s32.totalorder %s1632_s10, %s1626_s8 }
 0x2ae   : > { %p1629_p6 = pneg %p1628_p1  ;;  %p1635_p2 = por %p1634_p11, %p1633_p13 }
 0x2b0   : > { %p1636_p5 = pnand %p1635_p2, %p1629_p6 }
 0x363   : > { %v843_v0 = vpop.f32.mrb[4].mxu0 }
 0x364   : > { %1066 = vst.msk [vmem:[%s378_s7] sm:$0xff] %vm413_vm1, %v843_v0  ;;  %v1392_v7 = vpop.f32.mrb[5].mxu0 }
 0x367   : > { %v916_v8 = vpop.f32.mrb[4].mxu1 }
 0x368   : > { %1067 = vst.msk [vmem:[%s378_s7 + $0x8] sm:$0xff] %vm413_vm1, %v916_v8  ;;  %v989_v9 = vpop.f32.mrb[6].mxu0  ;;  %v1397_v10 = vpop.f32.mrb[5].mxu1 }
 0x369   : > { %1068 = vst.msk [vmem:[%s378_s7 + $0x10] sm:$0xff] %vm413_vm1, %v989_v9  ;;  %v1402_v11 = vpop.f32.mrb[7].mxu0 }
 0x36b   : > { %v1062_v12 = vpop.f32.mrb[6].mxu1 }
 0x36c   : > { %1069 = vst.msk [vmem:[%s378_s7 + $0x18] sm:$0xff] %vm413_vm1, %v1062_v12  ;;  %v1407_v13 = vpop.f32.mrb[7].mxu1 }
 0x36d   : > { %1639 = shalt.err (!%p1636_p5)
}
 0x36e   : > { %s1640_s21 = scalar_lea.hbm %s2100_s28, 512  ;;  %s1644_s12 = scalar_lea.hbm %s2157_s4, 1024 }
 0x36f   : > { %p1641_p7 = scmp.ne.s32.totalorder %s2100_s28, %s1640_s21  ;;  %p1645_p0 = scmp.lt.u32.totalorder %s2100_s28, %s2157_s4 }
 0x370   : > { %p1646_p8 = scmp.lt.u32.totalorder %s1644_s12, %s1640_s21  ;;  %p1648_p12 = scmp.lt.u32.totalorder %s1640_s21, %s2100_s28 }
 0x371   : > { %p1642_p4 = pnand %p1641_p7, %p2194_p10 }
 0x372   : > { %p1647_p9 = por %p1646_p8, %p1645_p0 }
 0x373   : > { %p1643_p3 = pneg %p1642_p4 }
 0x374   : > { %p1649_p1 = por %p1648_p12, %p1647_p9 }
 0x376   : > { %p1650_p6 = pnand %p1649_p1, %p1643_p3 }
 0x378   : > { %1653 = shalt.err (!%p1650_p6)
}
 0x379   : > { %1414 = dma.vmem_to_hbm [thread:$0]  (%p2194_p10), %s2092_s26, 512, %s2100_s28, %s1075_s16, %s1727_s30, %s1727_s30, %s1728_s23  }
 0x37a PF: > { %s2195_s9 = sld [smem:[#allocation19_spill]]  ;;  %s2196_s17 = sld [smem:[#allocation16_spill]] }
 0x37b   : > { %s1130_s24 = sand.u32 1, %s1696_s18  }
 0x37c   : > { %s1131_s7 = scalar_lea.sflag [#allocation4], %s1130_s24 }
 0x380   : > { %p2197_p13 = scmp.ne.s32.totalorder %s2195_s9, 0  ;;  %p2198_p11 = scmp.ge.s32.totalorder %s2196_s17, 2 }
 0x382   : > { %p1429_p2 = pnand %p2198_p11, %p2197_p13 }
 0x384   : > { %1687 = dma.done.wait (!%p1429_p2), %s1131_s7, 512  }
 0x385   : > { %1689 = vsyncadd (!%p1429_p2), %s1131_s7, 4294966784  ;;  %s1140_s6 = scalar_lea.sflag [#allocation10], %s1130_s24 }
 0x386   : > { %1691 = dma.done.wait (!%p1429_p2), %s1140_s6, 512  }
 0x387   : > { %1693 = vsyncadd (!%p1429_p2), %s1140_s6, 4294966784  ;;  %s28_s23 = sadd.s32 1, %s2196_s17   ;;  %s2199_s29 = sld [smem:[#allocation18_spill]] }
 0x388   : > { %p25_p5 = scmp.ge.s32.totalorder %s28_s23, 4   ;;  %s2200_s21 = sld [smem:[#allocation15_spill]] }
 0x389   : > { %s2201_s22 = sld [smem:[#allocation17_spill]]  ;;  %s2202_s18 = smov %s1700_s19 }
 0x38a   : > { %s2203_s19 = smov %s1704_s20  ;;  %27 = sbr.rel (!%p25_p5) target bundleno = 12 (0xc), region = 125 }
 0x38d   : > { %s2204_s20 = smov %s2199_s29 }
 0x391   :  { %1145 = vsyncpa [#allocation3], 1 }
 0x392   :  { %1147 = vsyncpa [#allocation3 + $0x1], 1 }
 0x393   :  { %1148 = vsyncpa [#allocation6], 1 }
 0x394   :  { %1150 = vsyncpa [#allocation6 + $0x1], 1 }
 0x395   :  { %1151 = vsyncpa [#allocation4], 1 }
 0x396   :  { %1153 = vsyncpa [#allocation4 + $0x1], 1 }
 0x397   :  { %1154 = vsyncpa [#allocation10], 1 }
 0x398   :  { %1156 = vsyncpa [#allocation10 + $0x1], 1 }

</bundles_post_ra>
